<compile_context>
chip_gen: v6e
topology: v6e:2x2x1
jax: 0.10.0
libtpu: 0.0.40
codegen_flags: <defaults>
</compile_context>

<pallas_src>
import functools

import jax
import jax.numpy as jnp
from jax.experimental import pallas as pl
from jax.experimental.pallas import tpu as pltpu


def _round_up(x, m):
    return (x + m - 1) // m * m


def _neumf_kernel(n_extra_layers, f_pad, u_ref, i_ref,
                  w0u_ref, w0i_ref, b0_ref, *rest):
    """One batch tile of the NeuMF forward, transposed (feature, batch) layout.

    u_ref / i_ref : (f_pad + d, TB)  rows = [gmf emb (zero-padded) | mlp emb]
    w0u / w0i     : (H1, d)          first MLP layer split over the concat
    b0            : (H1, 1) f32
    rest          : [w_l (H_{l+1},H_l), b_l (H_{l+1},1)] * n_extra_layers,
                    w_g (f_pad,1) f32, w_m (H_last,1) f32, b_neu (1,1) f32,
                    out (1, TB) f32
    """
    layer_refs = rest[:2 * n_extra_layers]
    w_g_ref, w_m_ref, b_neu_ref, out_ref = rest[2 * n_extra_layers:]

    u = u_ref[...]                                    # (f_pad + d, TB)
    i = i_ref[...]
    gmf_u = u[:f_pad, :].astype(jnp.float32)
    gmf_i = i[:f_pad, :].astype(jnp.float32)
    mlp_u = u[f_pad:, :]
    mlp_i = i[f_pad:, :]

    # GMF branch folded to its (1, TB) partial logit immediately (VPU + XLU);
    # live intermediate is a single lane-dense row, not (F, TB).
    gmf_logit = jnp.sum(gmf_u * gmf_i * w_g_ref[...], axis=0, keepdims=True)

    # First MLP layer: concat(mlp_u, mlp_i) folded into two MXU matmuls.
    h = (jnp.dot(w0u_ref[...], mlp_u, preferred_element_type=jnp.float32)
         + jnp.dot(w0i_ref[...], mlp_i, preferred_element_type=jnp.float32)
         + b0_ref[...])
    h = jnp.maximum(h, 0.0)                           # (H1, TB) f32

    # Remaining MLP layers, statically unrolled: (out,in) @ (in,TB) + ReLU.
    for l in range(n_extra_layers):
        w = layer_refs[2 * l][...]
        b = layer_refs[2 * l + 1][...]
        h = jnp.dot(w, h.astype(w.dtype),
                    preferred_element_type=jnp.float32) + b
        h = jnp.maximum(h, 0.0)

    # Final NeuMF Linear(., 1) as multiply + sublane reduce; result is already
    # a lane-dense (1, TB) row.  Sigmoid / scale in f32.
    mlp_logit = jnp.sum(h * w_m_ref[...], axis=0, keepdims=True)
    logit = gmf_logit + mlp_logit + b_neu_ref[...]
    out_ref[...] = jax.nn.sigmoid(logit) * 5.0


def init_params(key, n_users, n_items, n_factors_gmf, hidden_layers_mlp):
    """Deterministic synthetic parameter init (shapes match the torch module)."""
    keys = jax.random.split(key, 16)
    ki = iter(range(16))
    params = {}
    # Embeddings (torch nn.Embedding default: N(0, 1)).
    params["gmf_user_emb"] = jax.random.normal(
        keys[next(ki)], (n_users, n_factors_gmf), jnp.float32)
    params["gmf_item_emb"] = jax.random.normal(
        keys[next(ki)], (n_items, n_factors_gmf), jnp.float32)
    mlp_emb_dim = hidden_layers_mlp[0] // 2
    params["mlp_user_emb"] = jax.random.normal(
        keys[next(ki)], (n_users, mlp_emb_dim), jnp.float32)
    params["mlp_item_emb"] = jax.random.normal(
        keys[next(ki)], (n_items, mlp_emb_dim), jnp.float32)

    # MLP linear layers: Linear(hidden[l], hidden[l+1]); stored (in, out).
    mlp_ws, mlp_bs = [], []
    for l in range(len(hidden_layers_mlp) - 1):
        fan_in, fan_out = hidden_layers_mlp[l], hidden_layers_mlp[l + 1]
        bound = 1.0 / jnp.sqrt(fan_in)
        mlp_ws.append(jax.random.uniform(
            keys[next(ki)], (fan_in, fan_out), jnp.float32, -bound, bound))
        mlp_bs.append(jax.random.uniform(
            keys[next(ki)], (1, fan_out), jnp.float32, -bound, bound))
    params["mlp_weights"] = mlp_ws
    params["mlp_biases"] = mlp_bs

    # neuMF_layer: Linear(n_factors_GMF + hidden[-1], 1), xavier_uniform
    # (gain('sigmoid') = 1.0). Stored transposed (in, 1).
    concat_dim = n_factors_gmf + hidden_layers_mlp[-1]
    limit = jnp.sqrt(6.0 / (concat_dim + 1))
    params["neumf_w"] = jax.random.uniform(
        keys[next(ki)], (concat_dim, 1), jnp.float32, -limit, limit)
    b_bound = 1.0 / jnp.sqrt(concat_dim)
    params["neumf_b"] = jax.random.uniform(
        keys[next(ki)], (1, 1), jnp.float32, -b_bound, b_bound)
    return params


def neumf_forward(users, items, params, n_factors_gmf, *,
                  tb=4096, compute_dtype=jnp.bfloat16):
    """NeuMF forward.

    tb: target batch tile (rows per grid step), multiple of 128.  The default
        4096 moves ~O(0.5-1 MiB) per grid step at these feature widths — large
        enough to amortize the per-step pipeline overhead on v5e/v6e/v7x while
        the double-buffered slab tiles stay far below every scoped-VMEM
        default (no vmem_limit override needed).  On v7x prefer a tb such that
        cdiv(B, tb) >= 2 so the "parallel" batch axis shards over both cores.
    compute_dtype: dtype of the activation slabs and MLP weights (bf16 halves
        the dominant HBM traffic); matmuls accumulate in f32 and the final
        sigmoid/scale is f32.
    """
    assert tb % 128 == 0, "batch tile must be a multiple of 128 (lane width)"
    B = users.shape[0]
    tb_eff = min(tb, _round_up(B, 128))       # don't over-pad tiny batches
    n_tiles = pl.cdiv(B, tb_eff)
    b_pad = n_tiles * tb_eff

    # Pad indices (index 0 is valid) so every tile is full; padded rows are
    # computed and discarded at the end.
    users_p = jnp.pad(users, (0, b_pad - B))
    items_p = jnp.pad(items, (0, b_pad - B))

    F = n_factors_gmf
    d = params["mlp_user_emb"].shape[1]
    # GMF section padded to the sublane packing granularity of compute_dtype
    # so the in-kernel split never crosses a packed (sublane, lane) tile.
    sub_pack = 8 * (4 // jnp.dtype(compute_dtype).itemsize)
    f_pad = _round_up(F, sub_pack)

    # Parameter-sized prep (tiny): combined per-entity tables in compute_dtype.
    gmf_u_tbl = jnp.pad(params["gmf_user_emb"], ((0, 0), (0, f_pad - F)))
    gmf_i_tbl = jnp.pad(params["gmf_item_emb"], ((0, 0), (0, f_pad - F)))
    user_tbl = jnp.concatenate(
        [gmf_u_tbl, params["mlp_user_emb"]], axis=1).astype(compute_dtype)
    item_tbl = jnp.concatenate(
        [gmf_i_tbl, params["mlp_item_emb"]], axis=1).astype(compute_dtype)

    # --- glue: embedding row gathers (data-dependent lookups) in plain JAX ---
    # TODO(synk): fuse this gather into the kernel via scalar-prefetched indices.
    u_slab = user_tbl[users_p].T               # (f_pad + d, Bp), batch on lanes
    i_slab = item_tbl[items_p].T
    feat = f_pad + d

    # MLP weights in (out, in) layout; first layer split over the concat.
    mlp_ws = [w.T.astype(compute_dtype) for w in params["mlp_weights"]]
    mlp_bs = [b.T.astype(jnp.float32) for b in params["mlp_biases"]]
    w0u, w0i = mlp_ws[0][:, :d], mlp_ws[0][:, d:]
    n_extra = len(mlp_ws) - 1

    w_neu = params["neumf_w"].astype(jnp.float32)            # (F + H_last, 1)
    w_g = jnp.pad(w_neu[:F, :], ((0, f_pad - F), (0, 0)))    # (f_pad, 1)
    w_m = w_neu[F:, :]                                       # (H_last, 1)
    b_neu = params["neumf_b"].astype(jnp.float32)            # (1, 1)

    inputs = [u_slab, i_slab, w0u, w0i, mlp_bs[0]]
    for l in range(1, len(mlp_ws)):
        inputs += [mlp_ws[l], mlp_bs[l]]
    inputs += [w_g, w_m, b_neu]

    def resident_spec(a):
        return pl.BlockSpec(a.shape, lambda i: (0, 0))       # all params are 2-D

    in_specs = [pl.BlockSpec((feat, tb_eff), lambda i: (0, i)),   # user slab
                pl.BlockSpec((feat, tb_eff), lambda i: (0, i))]   # item slab
    in_specs += [resident_spec(a) for a in inputs[2:]]            # VMEM-resident

    # Advisory cost estimate so XLA schedules the surrounding gathers sensibly.
    mm_flops = 2 * sum(int(w.shape[0]) * int(w.shape[1]) for w in mlp_ws)
    flops = int(b_pad * (mm_flops + 3 * f_pad + 2 * int(w_m.shape[0]) + 8))
    bytes_accessed = int(
        (u_slab.size + i_slab.size) * jnp.dtype(compute_dtype).itemsize
        + sum(a.size * jnp.dtype(a.dtype).itemsize for a in inputs[2:])
        + 4 * b_pad)
    cost = pl.CostEstimate(flops=flops, transcendentals=b_pad,
                           bytes_accessed=bytes_accessed)

    out = pl.pallas_call(
        functools.partial(_neumf_kernel, n_extra, f_pad),
        out_shape=jax.ShapeDtypeStruct((1, b_pad), jnp.float32),
        grid=(n_tiles,),
        in_specs=in_specs,
        out_specs=pl.BlockSpec((1, tb_eff), lambda i: (0, i)),    # lane-dense out
        compiler_params=pltpu.CompilerParams(
            dimension_semantics=("parallel",)),
        cost_estimate=cost,
    )(*inputs)

    # torch: (sigmoid(out) * 5).view(-1); drop padded rows.
    return out.reshape(-1)[:B]


if __name__ == "__main__":
    # Small, module-consistent shapes; batch deliberately NOT a tile multiple.
    n_users, n_items = 32, 48
    n_factors_gmf = 8
    hidden_layers_mlp = [16, 32, 8]   # MLP embedding dim = 16 // 2 = 8 per tower
    batch = 200

    key = jax.random.PRNGKey(0)
    k_params, k_u, k_i = jax.random.split(key, 3)

    params = init_params(k_params, n_users, n_items, n_factors_gmf,
                         hidden_layers_mlp)
    users = jax.random.randint(k_u, (batch,), 0, n_users, jnp.int32)
    items = jax.random.randint(k_i, (batch,), 0, n_items, jnp.int32)

    # Pure-JAX reference matching the torch module math (f32 end to end).
    def ref_forward(users, items, params):
        gmf = params["gmf_user_emb"][users] * params["gmf_item_emb"][items]
        h = jnp.concatenate([params["mlp_user_emb"][users],
                             params["mlp_item_emb"][items]], axis=1)
        for w, b in zip(params["mlp_weights"], params["mlp_biases"]):
            h = jnp.maximum(h @ w + b, 0.0)
        concat = jnp.concatenate([gmf, h], axis=1)
        logit = concat @ params["neumf_w"] + params["neumf_b"]
        return (jax.nn.sigmoid(logit) * 5.0).reshape(-1)

    ref = ref_forward(users, items, params)

    # Exact-math path (f32) — tight tolerance.
    out_f32 = neumf_forward(users, items, params, n_factors_gmf,
                            compute_dtype=jnp.float32)
    out_f32 = jax.block_until_ready(out_f32)
    assert out_f32.shape == (batch,)
    assert jnp.allclose(out_f32, ref, atol=1e-5, rtol=1e-5)

    # Default bf16 path — loose tolerance (bf16-quantized inputs/weights,
    # f32 accumulation; outputs lie in [0, 5]).
    out_bf16 = neumf_forward(users, items, params, n_factors_gmf)
    out_bf16 = jax.block_until_ready(out_bf16)
    assert out_bf16.shape == (batch,)
    assert jnp.allclose(out_bf16, ref, atol=1e-1, rtol=5e-2)

    print("KERNEL_OK")
</pallas_src>

<mosaic_0001>
module attributes {stable_mosaic.version = 11 : i64} {
  func.func @_neumf_kernel(%arg0: i32, %arg1: memref<16x256xf32, #tpu.memory_space<vmem>>, %arg2: memref<16x256xf32, #tpu.memory_space<vmem>>, %arg3: memref<32x8xf32, #tpu.memory_space<vmem>>, %arg4: memref<32x8xf32, #tpu.memory_space<vmem>>, %arg5: memref<32x1xf32, #tpu.memory_space<vmem>>, %arg6: memref<8x32xf32, #tpu.memory_space<vmem>>, %arg7: memref<8x1xf32, #tpu.memory_space<vmem>>, %arg8: memref<8x1xf32, #tpu.memory_space<vmem>>, %arg9: memref<8x1xf32, #tpu.memory_space<vmem>>, %arg10: memref<1x1xf32, #tpu.memory_space<vmem>>, %arg11: memref<1x256xf32, #tpu.memory_space<vmem>>) attributes {dimension_semantics = [#tpu.dimension_semantics<parallel>], iteration_bounds = array<i64: 1>, scalar_prefetch = 0 : i64, scratch_operands = 0 : i64, tpu.core_type = #tpu.core_type<tc>, window_params = [{transform_indices = @transform_0, window_bounds = array<i64: 16, 256>}, {transform_indices = @transform_1, window_bounds = array<i64: 16, 256>}, {pipeline_mode = #tpu.pipeline_mode<synchronous>, transform_indices = @transform_2, window_bounds = array<i64: 32, 8>}, {pipeline_mode = #tpu.pipeline_mode<synchronous>, transform_indices = @transform_3, window_bounds = array<i64: 32, 8>}, {pipeline_mode = #tpu.pipeline_mode<synchronous>, transform_indices = @transform_4, window_bounds = array<i64: 32, 1>}, {pipeline_mode = #tpu.pipeline_mode<synchronous>, transform_indices = @transform_5, window_bounds = array<i64: 8, 32>}, {pipeline_mode = #tpu.pipeline_mode<synchronous>, transform_indices = @transform_6, window_bounds = array<i64: 8, 1>}, {pipeline_mode = #tpu.pipeline_mode<synchronous>, transform_indices = @transform_7, window_bounds = array<i64: 8, 1>}, {pipeline_mode = #tpu.pipeline_mode<synchronous>, transform_indices = @transform_8, window_bounds = array<i64: 8, 1>}, {pipeline_mode = #tpu.pipeline_mode<synchronous>, transform_indices = @transform_9, window_bounds = array<i64: 1, 1>}, {transform_indices = @transform_10, window_bounds = array<i64: 1, 256>}]} {
    %c0 = arith.constant 0 : index
    %c0_0 = arith.constant 0 : index
    %0 = vector.load %arg1[%c0, %c0_0] : memref<16x256xf32, #tpu.memory_space<vmem>>, vector<16x256xf32>
    %c0_1 = arith.constant 0 : index
    %c0_2 = arith.constant 0 : index
    %1 = vector.load %arg2[%c0_1, %c0_2] : memref<16x256xf32, #tpu.memory_space<vmem>>, vector<16x256xf32>
    %2 = vector.extract_strided_slice %0 {offsets = [0, 0], sizes = [8, 256], strides = [1, 1]} : vector<16x256xf32> to vector<8x256xf32>
    %3 = vector.extract_strided_slice %1 {offsets = [0, 0], sizes = [8, 256], strides = [1, 1]} : vector<16x256xf32> to vector<8x256xf32>
    %4 = vector.extract_strided_slice %0 {offsets = [8, 0], sizes = [8, 256], strides = [1, 1]} : vector<16x256xf32> to vector<8x256xf32>
    %5 = vector.extract_strided_slice %1 {offsets = [8, 0], sizes = [8, 256], strides = [1, 1]} : vector<16x256xf32> to vector<8x256xf32>
    %6 = arith.mulf %2, %3 : vector<8x256xf32>
    %c0_3 = arith.constant 0 : index
    %c0_4 = arith.constant 0 : index
    %7 = vector.load %arg8[%c0_3, %c0_4] : memref<8x1xf32, #tpu.memory_space<vmem>>, vector<8x1xf32>
    %8 = vector.broadcast %7 : vector<8x1xf32> to vector<8x256xf32>
    %9 = arith.mulf %6, %8 : vector<8x256xf32>
    %cst = arith.constant dense<0.000000e+00> : vector<256xf32>
    %10 = vector.multi_reduction <add>, %9, %cst [0] : vector<8x256xf32> to vector<256xf32>
    %11 = vector.shape_cast %10 : vector<256xf32> to vector<1x256xf32>
    %c0_5 = arith.constant 0 : index
    %c0_6 = arith.constant 0 : index
    %12 = vector.load %arg3[%c0_5, %c0_6] : memref<32x8xf32, #tpu.memory_space<vmem>>, vector<32x8xf32>
    %cst_7 = arith.constant dense<0.000000e+00> : vector<32x256xf32>
    %13 = tpu.matmul %12, %4, %cst_7 {dimension_numbers = #tpu.dot_dimension_numbers<[1], [0], [0], [1], [0, 0, 1, 1], [], []>} : vector<32x8xf32>, vector<8x256xf32>, vector<32x256xf32> -> vector<32x256xf32>
    %c0_8 = arith.constant 0 : index
    %c0_9 = arith.constant 0 : index
    %14 = vector.load %arg4[%c0_8, %c0_9] : memref<32x8xf32, #tpu.memory_space<vmem>>, vector<32x8xf32>
    %cst_10 = arith.constant dense<0.000000e+00> : vector<32x256xf32>
    %15 = tpu.matmul %14, %5, %cst_10 {dimension_numbers = #tpu.dot_dimension_numbers<[1], [0], [0], [1], [0, 0, 1, 1], [], []>} : vector<32x8xf32>, vector<8x256xf32>, vector<32x256xf32> -> vector<32x256xf32>
    %16 = arith.addf %13, %15 : vector<32x256xf32>
    %c0_11 = arith.constant 0 : index
    %c0_12 = arith.constant 0 : index
    %17 = vector.load %arg5[%c0_11, %c0_12] : memref<32x1xf32, #tpu.memory_space<vmem>>, vector<32x1xf32>
    %18 = vector.broadcast %17 : vector<32x1xf32> to vector<32x256xf32>
    %19 = arith.addf %16, %18 : vector<32x256xf32>
    %cst_13 = arith.constant 0.000000e+00 : f32
    %20 = vector.broadcast %cst_13 : f32 to vector<32x256xf32>
    %21 = arith.maximumf %19, %20 : vector<32x256xf32>
    %c0_14 = arith.constant 0 : index
    %c0_15 = arith.constant 0 : index
    %22 = vector.load %arg6[%c0_14, %c0_15] : memref<8x32xf32, #tpu.memory_space<vmem>>, vector<8x32xf32>
    %c0_16 = arith.constant 0 : index
    %c0_17 = arith.constant 0 : index
    %23 = vector.load %arg7[%c0_16, %c0_17] : memref<8x1xf32, #tpu.memory_space<vmem>>, vector<8x1xf32>
    %cst_18 = arith.constant dense<0.000000e+00> : vector<8x256xf32>
    %24 = tpu.matmul %22, %21, %cst_18 {dimension_numbers = #tpu.dot_dimension_numbers<[1], [0], [0], [1], [0, 0, 1, 1], [], []>} : vector<8x32xf32>, vector<32x256xf32>, vector<8x256xf32> -> vector<8x256xf32>
    %25 = vector.broadcast %23 : vector<8x1xf32> to vector<8x256xf32>
    %26 = arith.addf %24, %25 : vector<8x256xf32>
    %cst_19 = arith.constant 0.000000e+00 : f32
    %27 = vector.broadcast %cst_19 : f32 to vector<8x256xf32>
    %28 = arith.maximumf %26, %27 : vector<8x256xf32>
    %c0_20 = arith.constant 0 : index
    %c0_21 = arith.constant 0 : index
    %29 = vector.load %arg9[%c0_20, %c0_21] : memref<8x1xf32, #tpu.memory_space<vmem>>, vector<8x1xf32>
    %30 = vector.broadcast %29 : vector<8x1xf32> to vector<8x256xf32>
    %31 = arith.mulf %28, %30 : vector<8x256xf32>
    %cst_22 = arith.constant dense<0.000000e+00> : vector<256xf32>
    %32 = vector.multi_reduction <add>, %31, %cst_22 [0] : vector<8x256xf32> to vector<256xf32>
    %33 = vector.shape_cast %32 : vector<256xf32> to vector<1x256xf32>
    %34 = arith.addf %11, %33 : vector<1x256xf32>
    %c0_23 = arith.constant 0 : index
    %c0_24 = arith.constant 0 : index
    %35 = vector.load %arg10[%c0_23, %c0_24] : memref<1x1xf32, #tpu.memory_space<vmem>>, vector<1x1xf32>
    %36 = vector.broadcast %35 : vector<1x1xf32> to vector<1x256xf32>
    %37 = arith.addf %34, %36 : vector<1x256xf32>
    %38 = arith.negf %37 : vector<1x256xf32>
    %39 = math.exp %38 : vector<1x256xf32>
    %cst_25 = arith.constant 1.000000e+00 : f32
    %40 = vector.broadcast %cst_25 : f32 to vector<1x256xf32>
    %41 = arith.addf %40, %39 : vector<1x256xf32>
    %42 = arith.divf %40, %41 : vector<1x256xf32>
    %cst_26 = arith.constant 5.000000e+00 : f32
    %43 = vector.broadcast %cst_26 : f32 to vector<1x256xf32>
    %44 = arith.mulf %42, %43 : vector<1x256xf32>
    %c0_27 = arith.constant 0 : index
    %c0_28 = arith.constant 0 : index
    %45 = vector.load %arg11[%c0_27, %c0_28] : memref<1x256xf32, #tpu.memory_space<vmem>>, vector<1x256xf32>
    tpu.vector_store %arg11[%c0_27, %c0_28], %44 {strides = array<i32>} : memref<1x256xf32, #tpu.memory_space<vmem>>, vector<1x256xf32>,
    return
  }
  func.func @transform_0(%arg0: i32) -> (i32, i32) {
    %c0_i32 = arith.constant 0 : i32
    %c0_i32_0 = arith.constant 0 : i32
    return %c0_i32, %arg0 : i32, i32
  }
  func.func @transform_1(%arg0: i32) -> (i32, i32) {
    %c0_i32 = arith.constant 0 : i32
    %c0_i32_0 = arith.constant 0 : i32
    return %c0_i32, %arg0 : i32, i32
  }
  func.func @transform_2(%arg0: i32) -> (i32, i32) {
    %c0_i32 = arith.constant 0 : i32
    %c0_i32_0 = arith.constant 0 : i32
    %c0_i32_1 = arith.constant 0 : i32
    return %c0_i32, %c0_i32_0 : i32, i32
  }
  func.func @transform_3(%arg0: i32) -> (i32, i32) {
    %c0_i32 = arith.constant 0 : i32
    %c0_i32_0 = arith.constant 0 : i32
    %c0_i32_1 = arith.constant 0 : i32
    return %c0_i32, %c0_i32_0 : i32, i32
  }
  func.func @transform_4(%arg0: i32) -> (i32, i32) {
    %c0_i32 = arith.constant 0 : i32
    %c0_i32_0 = arith.constant 0 : i32
    %c0_i32_1 = arith.constant 0 : i32
    return %c0_i32, %c0_i32_0 : i32, i32
  }
  func.func @transform_5(%arg0: i32) -> (i32, i32) {
    %c0_i32 = arith.constant 0 : i32
    %c0_i32_0 = arith.constant 0 : i32
    %c0_i32_1 = arith.constant 0 : i32
    return %c0_i32, %c0_i32_0 : i32, i32
  }
  func.func @transform_6(%arg0: i32) -> (i32, i32) {
    %c0_i32 = arith.constant 0 : i32
    %c0_i32_0 = arith.constant 0 : i32
    %c0_i32_1 = arith.constant 0 : i32
    return %c0_i32, %c0_i32_0 : i32, i32
  }
  func.func @transform_7(%arg0: i32) -> (i32, i32) {
    %c0_i32 = arith.constant 0 : i32
    %c0_i32_0 = arith.constant 0 : i32
    %c0_i32_1 = arith.constant 0 : i32
    return %c0_i32, %c0_i32_0 : i32, i32
  }
  func.func @transform_8(%arg0: i32) -> (i32, i32) {
    %c0_i32 = arith.constant 0 : i32
    %c0_i32_0 = arith.constant 0 : i32
    %c0_i32_1 = arith.constant 0 : i32
    return %c0_i32, %c0_i32_0 : i32, i32
  }
  func.func @transform_9(%arg0: i32) -> (i32, i32) {
    %c0_i32 = arith.constant 0 : i32
    %c0_i32_0 = arith.constant 0 : i32
    %c0_i32_1 = arith.constant 0 : i32
    return %c0_i32, %c0_i32_0 : i32, i32
  }
  func.func @transform_10(%arg0: i32) -> (i32, i32) {
    %c0_i32 = arith.constant 0 : i32
    %c0_i32_0 = arith.constant 0 : i32
    return %c0_i32, %arg0 : i32, i32
  }
}

</mosaic_0001>

<bundles_post_ra>
// kernel: tpu_custom_call.1
= control target key start
LH: loop header
LB: loop body
LE: loop exit
PB: predicated region body
PF: predicated region fallthrough
CT: control target
= control target key end

     0   :  { %s680_s0 = inlined_call_operand.vmem [shape: f32[16,256], index: 0, kind: input, shape index: {}]   ;;  %s681_s1 = inlined_call_operand.vmem [shape: f32[16,256], index: 1, kind: input, shape index: {}]   ;;  %s682_s2 = inlined_call_operand.vmem [shape: f32[32,8], index: 2, kind: input, shape index: {}]   ;;  %s683_s3 = inlined_call_operand.vmem [shape: f32[32,8], index: 3, kind: input, shape index: {}]   ;;  %s684_s4 = inlined_call_operand.vmem [shape: f32[32,1], index: 4, kind: input, shape index: {}]   ;;  %s685_s5 = inlined_call_operand.vmem [shape: f32[8,32], index: 5, kind: input, shape index: {}]   ;;  %s686_s6 = inlined_call_operand.vmem [shape: f32[8,1], index: 6, kind: input, shape index: {}]   ;;  %s687_s7 = inlined_call_operand.vmem [shape: f32[8,1], index: 7, kind: input, shape index: {}]   ;;  %s688_s8 = inlined_call_operand.vmem [shape: f32[8,1], index: 8, kind: input, shape index: {}]   ;;  %s689_s9 = inlined_call_operand.<no memory space> [shape: f32[1,1], index: 9, kind: input, shape index: {}]   ;;  %s690_s10 = inlined_call_operand.hbm [shape: f32[1,256], index: 10, kind: output, shape index: {}]  }
   0x1   :  { %v15_v0 = vstv %s689_s9 }
   0x2   :  { %16 = vst [vmem:[#allocation2] sm:$0x1] %v15_v0 }
   0x3   :  { %v45_v1 = vld [vmem:[%s681_s1 + $0x18] sm:$0xff]  ;;  %v44_v3 = vld [vmem:[%s681_s1 + $0x10] sm:$0xff]  ;;  %v72_v5 = vld [vmem:[%s683_s3] sm:$0xff]  ;;  %vm76_vm0 = vcmask 64512   ;;  %v535_v7 = vmov 0.0   ;;  %v536_v12 = vmov 0  }
   0x4   :  { %v41_v2 = vld [vmem:[%s680_s0 + $0x18] sm:$0xff]  ;;  %119 = vmatprep.subr.mxu0 %v45_v1  ;;  %v40_v4 = vld [vmem:[%s680_s0 + $0x10] sm:$0xff]  ;;  %v68_v6 = vld [vmem:[%s682_s2] sm:$0xff]  ;;  %153 = vmatprep.mubr.f32.mxu0 %v535_v7 }
   0x5   :  { %220 = vmatprep.subr.mxu1 %v41_v2  ;;  %120 = vmatpush1.msra.mxu0 %v44_v3  ;;  %v280_v8 = vld [vmem:[%s684_s4 + $0x8] sm:$0xff]  ;;  %v282_v9 = vld [vmem:[%s684_s4 + $0x18] sm:$0xff] }
   0x6   :  { %221 = vmatpush1.msra.mxu1 %v40_v4  ;;  %254 = vmatprep.mubr.f32.mxu1 %v535_v7  ;;  %v73_v10 = vld [vmem:[%s683_s3 + $0x8] sm:$0xff] }
   0x7   :  { %488 = vmatmul.mubr.msk.f32.vlgmr.msra.gmra.mxu0 %vm76_vm0, %v72_v5  ;;  %492 = vmatmul.mubr.msk.f32.vlgmr.msra.gmra.mxu1 %vm76_vm0, %v68_v6  ;;  %v69_v11 = vld [vmem:[%s682_s2 + $0x8] sm:$0xff] }
   0x8   :  { %159 = vmatprep.mubr.f32.mxu0 %v535_v7  ;;  %260 = vmatprep.mubr.f32.mxu1 %v535_v7 }
   0x9   :  { %504 = vset.pattern.permute.xlu1 %v536_v12  ;;  %503 = vset.pattern.permute.xlu0 %v536_v12 }
   0xa   :  { %17 = vsyncpa [#allocation4], 0  ;;  %290 = vperm.xlu1 %504, %v280_v8   ;;  %300 = vperm.xlu0 %503, %v282_v9   ;;  %v279_v13 = vld [vmem:[%s684_s4] sm:$0xff]  ;;  %v281_v14 = vld [vmem:[%s684_s4 + $0x10] sm:$0xff]  ;;  %vm326_vm1 = vcmask 261120  }
   0xb   :  { %489 = vmatmul.mubr.msk.f32.gmra.mxu0 %vm76_vm0, %v73_v10  ;;  %493 = vmatmul.mubr.msk.f32.gmra.mxu1 %vm76_vm0, %v69_v11  ;;  %v74_v15 = vld [vmem:[%s683_s3 + $0x10] sm:$0xff]  ;;  %v320_v17 = vld [vmem:[%s686_s6] sm:$0xff]  ;;  %v75_v19 = vld [vmem:[%s683_s3 + $0x18] sm:$0xff] }
   0xc   :  { %165 = vmatprep.mubr.f32.mxu0 %v535_v7  ;;  %266 = vmatprep.mubr.f32.mxu1 %v535_v7  ;;  %v70_v16 = vld [vmem:[%s682_s2 + $0x10] sm:$0xff]  ;;  %v48_v18 = vld [vmem:[%s687_s7] sm:$0xff]  ;;  %v71_v20 = vld [vmem:[%s682_s2 + $0x18] sm:$0xff] }
   0xd   :  { %v403_v21 = vld [vmem:[%s688_s8] sm:$0xff]  ;;  %v39_v6 = vld [vmem:[%s680_s0 + $0x8] sm:$0xff] }
   0xe   :  { %285 = vperm.xlu1 %504, %v279_v13   ;;  %295 = vperm.xlu0 %503, %v281_v14   ;;  %v425_v22 = vld [vmem:[#allocation2] sm:$0x1] }
   0xf   :  { %490 = vmatmul.mubr.msk.f32.gmra.mxu0 %vm76_vm0, %v74_v15  ;;  %494 = vmatmul.mubr.msk.f32.gmra.mxu1 %vm76_vm0, %v70_v16  ;;  %v319_v3 = vld [vmem:[%s685_s5] sm:$0xff] }
  0x10   :  { %171 = vmatprep.mubr.f32.mxu0 %v535_v7  ;;  %272 = vmatprep.mubr.f32.mxu1 %v535_v7  ;;  %v38_v4 = vld [vmem:[%s680_s0] sm:$0xff]  ;;  %s538_s0 = smov [#allocation3]  }
  0x11   :  { %v42_v5 = vld [vmem:[%s681_s1] sm:$0xff] }
  0x12   :  { %323 = vperm.xlu0 %503, %v320_v17   ;;  %51 = vperm.xlu1 %504, %v48_v18   ;;  %v46_v8 = vmul.f32 %v42_v5, %v38_v4 }
  0x13   :  { %491 = vmatmul.mubr.msk.f32.gmra.mxu0 %vm76_vm0, %v75_v19  ;;  %495 = vmatmul.mubr.msk.f32.gmra.mxu1 %vm76_vm0, %v71_v20 }
  0x14   :  { %394 = vmatprep.mubr.f32.mxu0 %v535_v7  ;;  %v43_v7 = vld [vmem:[%s681_s1 + $0x8] sm:$0xff]  ;;  %s480_s1 = sshll.u32 %s538_s0, 4  ;;  %s481_s1 = int_to_ptr.vmem [resolvable:$true] %s480_s1 }
  0x15   :  { %v47_v10 = vmul.f32 %v43_v7, %v39_v6  ;;  %s513_s5 = scalar_lea.vmem %s481_s1, 32  ;;  %p518_p1 = scmp.lt.s32.totalorder %s481_s1, %s481_s1 }
  0x16   :  { %406 = vperm.xlu0 %503, %v403_v21   ;;  %428 = vperm.xlu1 %504, %v425_v22   ;;  %p514_p0 = scmp.ne.s32.totalorder %s481_s1, %s513_s5  ;;  %p519_p2 = scmp.lt.s32.totalorder %s513_s5, %s513_s5 }
  0x18   :  { %p520_p3 = por %p519_p2, %p518_p1 }
  0x1a   :  { %p521_p4 = pnand %p520_p3, %p514_p0 }
  0x85   :  { %v301_v33 = vpop.permute.xlu0 %300  ;;  %v291_v38 = vpop.permute.xlu1 %290 }
  0x89   :  { %v296_v47 = vpop.permute.xlu0 %295  ;;  %v286_v54 = vpop.permute.xlu1 %285 }
  0x8d   :  { %v52_v9 = vpop.permute.xlu1 %51  ;;  %v324_v14 = vpop.permute.xlu0 %323 }
  0x8e   :  { %v54_v11 = vmul.f32 %v52_v9, %v46_v8  ;;  %v55_v12 = vmul.f32 %v52_v9, %v47_v10 }
  0x90   :  { %v56_v13 = vrot.slane %v54_v11, 4  ;;  %v62_v15 = vrot.slane %v55_v12, 4 }
  0x92   :  { %v57_v17 = vadd.f32 %v56_v13, %v54_v11  ;;  %v63_v20 = vadd.f32 %v62_v15, %v55_v12 }
  0xc7   :  { %v155_v23 = vpop.f32.mrf.mxu0  ;;  %v256_v24 = vpop.f32.mrf.mxu1 }
  0xc8   :  { %v257_v52 = vadd.f32 %v256_v24, %v155_v23  ;;  %v407_v23 = vpop.permute.xlu0 %406  ;;  %v58_v24 = vrot.slane %v57_v17, 2 }
  0xc9   :  { %v157_v25 = vpop.f32.mrf.mxu0  ;;  %v258_v26 = vpop.f32.mrf.mxu1 }
  0xca   :  { %v259_v49 = vadd.f32 %v258_v26, %v157_v25  ;;  %v303_v61 = vadd.f32 %v286_v54, %v257_v52 }
  0xcb   :  { %v161_v27 = vpop.f32.mrf.mxu0  ;;  %v262_v28 = vpop.f32.mrf.mxu1 }
  0xcc   :  { %v263_v46 = vadd.f32 %v262_v28, %v161_v27  ;;  %v304_v59 = vadd.f32 %v286_v54, %v259_v49  ;;  %v311_v2 = vmax.f32 %v303_v61, 0.0  ;;  %v64_v27 = vrot.slane %v63_v20, 2 }
  0xcd   :  { %v163_v29 = vpop.f32.mrf.mxu0  ;;  %v264_v30 = vpop.f32.mrf.mxu1  ;;  %v431_v28 = vlaneseq }
  0xce   :  { %v265_v44 = vadd.f32 %v264_v30, %v163_v29  ;;  %v305_v57 = vadd.f32 %v291_v38, %v263_v46  ;;  %v312_v1 = vmax.f32 %v304_v59, 0.0 }
  0xcf   :  { %v167_v31 = vpop.f32.mrf.mxu0  ;;  %v268_v32 = vpop.f32.mrf.mxu1  ;;  %vm471_vm2 = vcmp.lt.s32.totalorder %v431_v28, 256 }
  0xd0   :  { %v269_v41 = vadd.f32 %v268_v32, %v167_v31  ;;  %v306_v55 = vadd.f32 %v291_v38, %v265_v44  ;;  %v313_v0 = vmax.f32 %v305_v57, 0.0  ;;  %v59_v31 = vadd.f32 %v58_v24, %v57_v17 }
  0xd1   :  { %v169_v34 = vpop.f32.mrf.mxu0  ;;  %v270_v35 = vpop.f32.mrf.mxu1 }
  0xd2   :  { %v271_v39 = vadd.f32 %v270_v35, %v169_v34  ;;  %v307_v53 = vadd.f32 %v296_v47, %v269_v41  ;;  %v314_v63 = vmax.f32 %v306_v55, 0.0  ;;  %v65_v34 = vadd.f32 %v64_v27, %v63_v20 }
  0xd3   :  { %v173_v36 = vpop.f32.mrf.mxu0  ;;  %v274_v37 = vpop.f32.mrf.mxu1  ;;  %v432_v35 = vshrl.u32 %v431_v28, 7  ;;  %v60_v38 = vrot.slane %v59_v31, 1 }
  0xd4   :  { %v275_v40 = vadd.f32 %v274_v37, %v173_v36  ;;  %v308_v50 = vadd.f32 %v296_v47, %v271_v39  ;;  %v315_v62 = vmax.f32 %v307_v53, 0.0  ;;  %v66_v41 = vrot.slane %v65_v34, 1 }
  0xd5   :  { %v175_v42 = vpop.f32.mrf.mxu0  ;;  %v276_v43 = vpop.f32.mrf.mxu1  ;;  %v61_v46 = vadd.f32 %v60_v38, %v59_v31 }
  0xd6   :  { %v277_v45 = vadd.f32 %v276_v43, %v175_v42  ;;  %v309_v48 = vadd.f32 %v301_v33, %v275_v40  ;;  %v316_v60 = vmax.f32 %v308_v50, 0.0  ;;  %v433_v42 = vsub.s32 0, %v432_v35 }
  0xd7   :  { %v67_v49 = vadd.f32 %v66_v41, %v65_v34 }
  0xd8   :  { %v310_v51 = vadd.f32 %v301_v33, %v277_v45  ;;  %v317_v58 = vmax.f32 %v309_v48, 0.0  ;;  %v429_v45 = vpop.permute.xlu1 %428 }
  0xd9   :  { %v434_v50 = vrot.slane %v429_v45, %v433_v42 }
  0xda   :  { %v318_v56 = vmax.f32 %v310_v51, 0.0 }
  0xdc   :  { %354 = vmatprep.subr.mxu0 %v318_v56 }
  0xdd   :  { %355 = vmatpush1.msra.mxu0 %v317_v58 }
  0xde   :  { %356 = vmatprep.subr.mxu0 %v316_v60 }
  0xdf   :  { %357 = vmatpush1.msra.mxu0 %v315_v62  ;;  %v537_v62 = vmov 1966171168  }
  0xe0   :  { %358 = vmatprep.subr.mxu0 %v314_v63  ;;  %v455_v63 = vunpack.c.l.s4 %v537_v62 }
  0xe1   :  { %359 = vmatpush1.msra.mxu0 %v313_v0 }
  0xe2   :  { %360 = vmatprep.subr.mxu0 %v312_v1  ;;  %v456_v0 = vunpack.c.0.s8 %v455_v63 }
  0xe3   :  { %361 = vmatpush1.msra.mxu0 %v311_v2 }
  0xe4   :  { %496 = vmatmul.mubr.msk.f32.vlgmr.msra.gmra.mxu0 %vm326_vm1, %v319_v3  ;;  %v459_v5 = vsub.s32 %v456_v0, %v432_v35 }
 0x1a4   :  { %v396_v16 = vpop.f32.mrf.mxu0 }
 0x1a5   :  { %v397_v18 = vadd.f32 %v396_v16, %v324_v14 }
 0x1a6   :  { %v398_v19 = vpop.f32.mrf.mxu0 }
 0x1a7   :  { %v401_v21 = vmax.f32 %v397_v18, 0.0  ;;  %v399_v22 = vadd.f32 %v398_v19, %v324_v14 }
 0x1a9   :  { %v409_v25 = vmul.f32 %v407_v23, %v401_v21  ;;  %v402_v26 = vmax.f32 %v399_v22, 0.0 }
 0x1ab   :  { %v411_v29 = vrot.slane %v409_v25, 4  ;;  %v410_v30 = vmul.f32 %v407_v23, %v402_v26 }
 0x1ad   :  { %v412_v32 = vadd.f32 %v411_v29, %v409_v25  ;;  %v417_v33 = vrot.slane %v410_v30, 4 }
 0x1af   :  { %v413_v36 = vrot.slane %v412_v32, 2  ;;  %v418_v37 = vadd.f32 %v417_v33, %v410_v30 }
 0x1b1   :  { %v414_v39 = vadd.f32 %v413_v36, %v412_v32  ;;  %v419_v40 = vrot.slane %v418_v37, 2 }
 0x1b3   :  { %v415_v43 = vrot.slane %v414_v39, 1  ;;  %v420_v44 = vadd.f32 %v419_v40, %v418_v37 }
 0x1b5   :  { %v416_v47 = vadd.f32 %v415_v43, %v414_v39  ;;  %v421_v48 = vrot.slane %v420_v44, 1 }
 0x1b7   :  { %v423_v51 = vadd.f32 %v416_v47, %v61_v46  ;;  %v422_v52 = vadd.f32 %v421_v48, %v420_v44 }
 0x1b9   :  { %v435_v53 = vadd.f32 %v434_v50, %v423_v51  ;;  %v424_v54 = vadd.f32 %v422_v52, %v67_v49 }
 0x1bb   :  { %v497_v55 = vmul.f32 -1.442695, %v435_v53  ;;  %v436_v56 = vadd.f32 %v434_v50, %v424_v54 }
 0x1bd   :  { %505 = vpow2.f32 %v497_v55  ;;  %v498_v57 = vmul.f32 -1.442695, %v436_v56 }
 0x1bf   :  { %507 = vpow2.f32 %v498_v57 }
 0x1ca   :  { %v506_v58 = vpop.eup %505 }
 0x1cb   :  { %v443_v59 = vadd.f32 1.0, %v506_v58 }
 0x1cc   :  { %v508_v60 = vpop.eup %507 }
 0x1cd   :  { %v444_v61 = vadd.f32 1.0, %v508_v60  ;;  %509 = vrcp.f32 %v443_v59 }
 0x1cf   :  { %511 = vrcp.f32 %v444_v61 }
 0x1da   :  { %v510_v1 = vpop.eup %509 }
 0x1db   :  { %v449_v3 = vmul.f32 5.0, %v510_v1 }
 0x1dc   :  { %v512_v2 = vpop.eup %511 }
 0x1dd   :  { %v450_v4 = vmul.f32 5.0, %v512_v2 }
 0x1df   :  { %v453_v6 = vcombine.low %v449_v3, %v450_v4 }
 0x1e1   :  { %v460_v7 = vrot.slane %v453_v6, %v459_v5 }
 0x1e3   :  { %v467_v8 = vrot.slane %v460_v7, %v459_v5 }
 0x1e5   :  { %473 = vst.msk [vmem:[#allocation3] sm:$0x3] %vm471_vm2, %v467_v8 }
 0x1e6   :  { %524 = shalt.err (!%p521_p4)
}
 0x1e7   :  { %483 = dma.vmem_to_hbm [thread:$0]  %s481_s1, 32, %s690_s10, [#allocation4]  }
 0x1e8   :  { %533 = dma.done.wait [#allocation4], 32  }
 0x1e9   :  { %534 = vsyncadd [#allocation4], 4294967264 }
 0x1ea   :  { %487 = vsyncpa [#allocation4], 1 }

</bundles_post_ra>
